<compile_context>
chip_gen: v5e
topology: v5e:2x2
jax: 0.10.0
libtpu: 0.0.40
codegen_flags: <defaults>
</compile_context>

<pallas_src>
import functools

import jax
import jax.numpy as jnp
from jax.experimental import pallas as pl
from jax.experimental.pallas import tpu as pltpu

STATE_DIM = 4      # CartPole-v1 observation_space.shape[0]
HIDDEN = 128
LANE = 128         # TPU lane width


def _tpu_kind() -> str:
    """Lower-cased device kind ('tpu v5 lite', 'tpu v6e', ...); '' if unknown."""
    try:
        return jax.devices()[0].device_kind.lower()
    except Exception:   # defensive: never let detection break the forward pass
        return ""


def critic_kernel(xT_ref, w1_ref, b1_ref, w2_ref, b2_ref, w3_ref, b3_ref, o_ref):
    """One batch tile of the critic MLP, unpacked fc2 (any TPU generation).

    xT_ref : (STATE_DIM, T)  state tile, features on sublanes, batch on lanes
    w1_ref : (HIDDEN, STATE_DIM)  fc1 weight (PyTorch (out, in) layout), f32
    b1_ref : (HIDDEN, 1) f32
    w2_ref : (HIDDEN, HIDDEN)     fc2 weight, pre-cast to bf16 in the wrapper
    b2_ref : (HIDDEN, 1) f32
    w3_ref : (HIDDEN, 1) f32      fc3 weight stored as a column
    b3_ref : (1,) f32 in SMEM
    o_ref  : (1, T) f32           lane-dense value row for this batch tile
    """
    xT = xT_ref[...]                                   # (STATE_DIM, T)
    w1 = w1_ref[...]                                   # (HIDDEN, STATE_DIM)

    # fc1: K = 4 is far too small for the MXU -> unrolled VPU broadcast FMAs.
    acc = w1[:, 0:1] * xT[0:1, :]
    for k in range(1, STATE_DIM):                      # static unroll (tiny K)
        acc = acc + w1[:, k:k + 1] * xT[k:k + 1, :]
    h1 = jnp.maximum(acc + b1_ref[...], 0.0)           # (HIDDEN, T) f32

    # fc2: the only real matmul -> MXU, bf16 operands, f32 accumulate.
    h2 = jnp.dot(w2_ref[...], h1.astype(jnp.bfloat16),
                 preferred_element_type=jnp.float32)
    h2 = jnp.maximum(h2 + b2_ref[...], 0.0)            # (HIDDEN, T) f32

    # fc3: N = 1 matmul is degenerate on the MXU -> VPU multiply + sublane
    # (XLU) reduction; result is already a lane-dense (1, T) row.
    v = jnp.sum(h2 * w3_ref[...], axis=0, keepdims=True) + b3_ref[0]
    o_ref[...] = v


def critic_kernel_packed(xT_ref, w1_ref, b1_ref, w2b_ref, b2b_ref, w3_ref,
                         b3_ref, o_ref):
    """Block-diagonal fc2 variant for the 256x256 MXU (v6e / v7x).

    Identical math; the batch tile is split into two half-tiles that are
    stacked along the feature (sublane) axis so a single
    (2H, 2H) x (2H, T/2) matmul fills both MXU quadrants.

    w2b_ref : (2*HIDDEN, 2*HIDDEN) bf16, block-diag(w2, w2)
    b2b_ref : (2*HIDDEN, 1) f32,  vstack(b2, b2)
    """
    T = xT_ref.shape[1]
    half = T // 2                                      # multiple of 128 (gated)

    xT = xT_ref[...]
    w1 = w1_ref[...]

    # fc1 on the VPU, exactly as in the unpacked kernel.
    acc = w1[:, 0:1] * xT[0:1, :]
    for k in range(1, STATE_DIM):
        acc = acc + w1[:, k:k + 1] * xT[k:k + 1, :]
    h1 = jnp.maximum(acc + b1_ref[...], 0.0).astype(jnp.bfloat16)   # (H, T)

    # Stack two batch half-tiles on the sublane axis: (H, T) -> (2H, T/2).
    # Aligned sublane concat of bf16 tiles (pure vld/vst copy, rides under
    # the MXU's slack).
    h1p = jnp.concatenate([h1[:, :half], h1[:, half:]], axis=0)      # (2H, T/2)

    # fc2: one (256,256) x (256, T/2) bf16 matmul, f32 accumulate.
    h2p = jnp.dot(w2b_ref[...], h1p, preferred_element_type=jnp.float32)
    h2p = jnp.maximum(h2p + b2b_ref[...], 0.0)                       # (2H, T/2)

    # fc3 per half (the two halves must NOT be reduced together), then
    # re-assemble the lane-dense (1, T) output row.
    w3 = w3_ref[...]                                                 # (H, 1)
    va = jnp.sum(h2p[:HIDDEN, :] * w3, axis=0, keepdims=True)        # (1, T/2)
    vb = jnp.sum(h2p[HIDDEN:, :] * w3, axis=0, keepdims=True)        # (1, T/2)
    o_ref[...] = jnp.concatenate([va, vb], axis=1) + b3_ref[0]


@functools.partial(jax.jit, static_argnames=("tile_b",))
def critic_forward(state, params, *, tile_b=2048):
    """state: (B, STATE_DIM) f32 -> value: (B, 1) f32.

    tile_b: batch tile (sweep 1024-2048); clamped to the padded batch, halved
    on v7x so both TensorCores get grid steps.
    """
    w1, b1, w2, b2, w3, b3 = params
    B = state.shape[0]

    kind = _tpu_kind()
    is_v7 = ("v7" in kind) or ("7x" in kind)
    wide_mxu = is_v7 or ("v6" in kind)        # generations with a 256x256 MXU

    # ---- batch tile selection ----------------------------------------------
    b_ceil = pl.cdiv(B, LANE) * LANE          # smallest lane multiple >= B
    tb = max(LANE, min(tile_b, b_ceil))
    if is_v7 and b_ceil >= 2 * LANE:
        # v7x has 2 TensorCores; guarantee >= 2 "parallel" grid steps.
        tb = min(tb, max(LANE, pl.cdiv(b_ceil // 2, LANE) * LANE))
    b_pad = pl.cdiv(B, tb) * tb
    grid = (b_pad // tb,)

    # Block-diag fc2 packing only pays off on the 256x256 MXU and needs the
    # half-tile to stay lane aligned.
    use_packed = wide_mxu and (tb % (2 * LANE) == 0)

    # ---- wrapper-side layout plumbing (kept minimal, see header) ------------
    state_t = state.T                                    # (STATE_DIM, B)
    if b_pad != B:                                       # skipped when aligned
        state_t = jnp.pad(state_t, ((0, 0), (0, b_pad - B)))

    # fc2 operands in bf16 (pre-cast once here, not per grid step).
    w2_bf16 = w2.astype(jnp.bfloat16)

    state_spec = pl.BlockSpec((STATE_DIM, tb), lambda i: (0, i))
    out_spec = pl.BlockSpec((1, tb), lambda i: (0, i))   # lane-dense output
    const = lambda i: (0, 0)                              # VMEM-resident weights
    compiler_params = pltpu.CompilerParams(
        dimension_semantics=("parallel",),               # megacore sharding (v7x)
        # No vmem_limit_bytes needed: <= a few MB at tile_b <= 2048.
    )
    out_shape = jax.ShapeDtypeStruct((1, b_pad), jnp.float32)

    if use_packed:
        # block-diag(w2, w2) as bf16, built once per call (cheap; could be
        # pre-packed alongside the params in a training loop).
        w2_blk = jnp.zeros((2 * HIDDEN, 2 * HIDDEN), jnp.float32)
        w2_blk = w2_blk.at[:HIDDEN, :HIDDEN].set(w2).at[HIDDEN:, HIDDEN:].set(w2)
        w2_blk = w2_blk.astype(jnp.bfloat16)
        b2_blk = jnp.concatenate([b2, b2], axis=0)       # (2H, 1)

        out = pl.pallas_call(
            critic_kernel_packed,
            out_shape=out_shape,
            grid=grid,
            in_specs=[
                state_spec,
                pl.BlockSpec((HIDDEN, STATE_DIM), const),        # w1
                pl.BlockSpec((HIDDEN, 1), const),                # b1
                pl.BlockSpec((2 * HIDDEN, 2 * HIDDEN), const),   # w2 block-diag
                pl.BlockSpec((2 * HIDDEN, 1), const),            # b2 stacked
                pl.BlockSpec((HIDDEN, 1), const),                # w3 column
                pl.BlockSpec(memory_space=pltpu.MemorySpace.SMEM),  # b3 scalar
            ],
            out_specs=out_spec,
            compiler_params=compiler_params,
        )(state_t, w1, b1, w2_blk, b2_blk, w3, b3)
    else:
        out = pl.pallas_call(
            critic_kernel,
            out_shape=out_shape,
            grid=grid,
            in_specs=[
                state_spec,
                pl.BlockSpec((HIDDEN, STATE_DIM), const),        # w1
                pl.BlockSpec((HIDDEN, 1), const),                # b1
                pl.BlockSpec((HIDDEN, HIDDEN), const),           # w2 (bf16)
                pl.BlockSpec((HIDDEN, 1), const),                # b2
                pl.BlockSpec((HIDDEN, 1), const),                # w3 column
                pl.BlockSpec(memory_space=pltpu.MemorySpace.SMEM),  # b3 scalar
            ],
            out_specs=out_spec,
            compiler_params=compiler_params,
        )(state_t, w1, b1, w2_bf16, b2, w3, b3)

    return out[0, :B][:, None]                           # (B, 1)


def init_params(key, state_dim=STATE_DIM, hidden=HIDDEN):
    """torch.nn.Linear-style init U(-1/sqrt(fan_in), 1/sqrt(fan_in)),
    stored in the kernel's layout:
      w1: (hidden, state_dim)  == PyTorch fc1.weight
      b1: (hidden, 1)
      w2: (hidden, hidden)     == PyTorch fc2.weight
      b2: (hidden, 1)
      w3: (hidden, 1)          == PyTorch fc3.weight.T
      b3: (1,)
    """
    ks = jax.random.split(key, 6)

    def linear(kw, kb, fan_in, fan_out):
        bound = 1.0 / jnp.sqrt(jnp.float32(fan_in))
        w = jax.random.uniform(kw, (fan_out, fan_in), jnp.float32, -bound, bound)
        b = jax.random.uniform(kb, (fan_out, 1), jnp.float32, -bound, bound)
        return w, b

    w1, b1 = linear(ks[0], ks[1], state_dim, hidden)
    w2, b2 = linear(ks[2], ks[3], hidden, hidden)
    w3_pt, b3_col = linear(ks[4], ks[5], hidden, 1)      # w3_pt: (1, hidden)
    return (w1, b1, w2, b2, w3_pt.T, b3_col.reshape(1))


def critic_ref(state, params):
    """Pure-JAX f32 reference of the same forward pass (correctness check)."""
    w1, b1, w2, b2, w3, b3 = params
    h1 = jnp.maximum(state @ w1.T + b1.T, 0.0)
    h2 = jnp.maximum(h1 @ w2.T + b2.T, 0.0)
    return h2 @ w3 + b3


if __name__ == "__main__":
    key = jax.random.PRNGKey(0)
    k_params, k_state = jax.random.split(key)
    params = init_params(k_params)

    # bf16 fc2 operands -> loosened tolerance vs the f32 reference.
    ATOL = RTOL = 2e-2

    # 1) Small-shape smoke test (B = 8): single tile, unpacked path.
    B = 8
    state = jax.random.normal(k_state, (B, STATE_DIM), jnp.float32)
    value = jax.block_until_ready(critic_forward(state, params))
    expected = critic_ref(state, params)
    assert value.shape == (B, 1), value.shape
    assert jnp.allclose(value, expected, atol=ATOL, rtol=RTOL), (
        float(jnp.max(jnp.abs(value - expected))))

    # 2) Larger ragged batch: exercises the big-tile path, the batch padding,
    #    and (on v6e/v7x) the block-diagonal MXU packing / two-core split.
    B_big = 1000
    state_big = jax.random.normal(jax.random.PRNGKey(1), (B_big, STATE_DIM),
                                  jnp.float32)
    value_big = jax.block_until_ready(critic_forward(state_big, params))
    expected_big = critic_ref(state_big, params)
    assert value_big.shape == (B_big, 1), value_big.shape
    assert jnp.allclose(value_big, expected_big, atol=ATOL, rtol=RTOL), (
        float(jnp.max(jnp.abs(value_big - expected_big))))

    print("KERNEL_OK")
</pallas_src>

<mosaic_0001>
module attributes {stable_mosaic.version = 11 : i64} {
  func.func @critic_kernel(%arg0: i32, %arg1: memref<4x128xf32, #tpu.memory_space<vmem>>, %arg2: memref<128x4xf32, #tpu.memory_space<vmem>>, %arg3: memref<128x1xf32, #tpu.memory_space<vmem>>, %arg4: memref<128x128xbf16, #tpu.memory_space<vmem>>, %arg5: memref<128x1xf32, #tpu.memory_space<vmem>>, %arg6: memref<128x1xf32, #tpu.memory_space<vmem>>, %arg7: memref<1xf32, #tpu.memory_space<smem>>, %arg8: memref<1x128xf32, #tpu.memory_space<vmem>>) attributes {dimension_semantics = [#tpu.dimension_semantics<parallel>], iteration_bounds = array<i64: 1>, scalar_prefetch = 0 : i64, scratch_operands = 0 : i64, tpu.core_type = #tpu.core_type<tc>, window_params = [{transform_indices = @transform_0, window_bounds = array<i64: 4, 128>}, {pipeline_mode = #tpu.pipeline_mode<synchronous>, transform_indices = @transform_1, window_bounds = array<i64: 128, 4>}, {pipeline_mode = #tpu.pipeline_mode<synchronous>, transform_indices = @transform_2, window_bounds = array<i64: 128, 1>}, {pipeline_mode = #tpu.pipeline_mode<synchronous>, transform_indices = @transform_3, window_bounds = array<i64: 128, 128>}, {pipeline_mode = #tpu.pipeline_mode<synchronous>, transform_indices = @transform_4, window_bounds = array<i64: 128, 1>}, {pipeline_mode = #tpu.pipeline_mode<synchronous>, transform_indices = @transform_5, window_bounds = array<i64: 128, 1>}, {transform_indices = @transform_6, window_bounds = array<i64: 1>}, {transform_indices = @transform_7, window_bounds = array<i64: 1, 128>}]} {
    %c0 = arith.constant 0 : index
    %c0_0 = arith.constant 0 : index
    %0 = vector.load %arg1[%c0, %c0_0] : memref<4x128xf32, #tpu.memory_space<vmem>>, vector<4x128xf32>
    %c0_1 = arith.constant 0 : index
    %c0_2 = arith.constant 0 : index
    %1 = vector.load %arg2[%c0_1, %c0_2] : memref<128x4xf32, #tpu.memory_space<vmem>>, vector<128x4xf32>
    %2 = vector.extract_strided_slice %1 {offsets = [0, 0], sizes = [128, 1], strides = [1, 1]} : vector<128x4xf32> to vector<128x1xf32>
    %3 = vector.extract_strided_slice %0 {offsets = [0, 0], sizes = [1, 128], strides = [1, 1]} : vector<4x128xf32> to vector<1x128xf32>
    %4 = vector.broadcast %2 : vector<128x1xf32> to vector<128x128xf32>
    %5 = vector.broadcast %3 : vector<1x128xf32> to vector<128x128xf32>
    %6 = arith.mulf %4, %5 : vector<128x128xf32>
    %7 = vector.extract_strided_slice %1 {offsets = [0, 1], sizes = [128, 1], strides = [1, 1]} : vector<128x4xf32> to vector<128x1xf32>
    %8 = vector.extract_strided_slice %0 {offsets = [1, 0], sizes = [1, 128], strides = [1, 1]} : vector<4x128xf32> to vector<1x128xf32>
    %9 = vector.broadcast %7 : vector<128x1xf32> to vector<128x128xf32>
    %10 = vector.broadcast %8 : vector<1x128xf32> to vector<128x128xf32>
    %11 = arith.mulf %9, %10 : vector<128x128xf32>
    %12 = arith.addf %6, %11 : vector<128x128xf32>
    %13 = vector.extract_strided_slice %1 {offsets = [0, 2], sizes = [128, 1], strides = [1, 1]} : vector<128x4xf32> to vector<128x1xf32>
    %14 = vector.extract_strided_slice %0 {offsets = [2, 0], sizes = [1, 128], strides = [1, 1]} : vector<4x128xf32> to vector<1x128xf32>
    %15 = vector.broadcast %13 : vector<128x1xf32> to vector<128x128xf32>
    %16 = vector.broadcast %14 : vector<1x128xf32> to vector<128x128xf32>
    %17 = arith.mulf %15, %16 : vector<128x128xf32>
    %18 = arith.addf %12, %17 : vector<128x128xf32>
    %19 = vector.extract_strided_slice %1 {offsets = [0, 3], sizes = [128, 1], strides = [1, 1]} : vector<128x4xf32> to vector<128x1xf32>
    %20 = vector.extract_strided_slice %0 {offsets = [3, 0], sizes = [1, 128], strides = [1, 1]} : vector<4x128xf32> to vector<1x128xf32>
    %21 = vector.broadcast %19 : vector<128x1xf32> to vector<128x128xf32>
    %22 = vector.broadcast %20 : vector<1x128xf32> to vector<128x128xf32>
    %23 = arith.mulf %21, %22 : vector<128x128xf32>
    %24 = arith.addf %18, %23 : vector<128x128xf32>
    %c0_3 = arith.constant 0 : index
    %c0_4 = arith.constant 0 : index
    %25 = vector.load %arg3[%c0_3, %c0_4] : memref<128x1xf32, #tpu.memory_space<vmem>>, vector<128x1xf32>
    %26 = vector.broadcast %25 : vector<128x1xf32> to vector<128x128xf32>
    %27 = arith.addf %24, %26 : vector<128x128xf32>
    %cst = arith.constant 0.000000e+00 : f32
    %28 = vector.broadcast %cst : f32 to vector<128x128xf32>
    %29 = arith.maximumf %27, %28 : vector<128x128xf32>
    %c0_5 = arith.constant 0 : index
    %c0_6 = arith.constant 0 : index
    %30 = vector.load %arg4[%c0_5, %c0_6] : memref<128x128xbf16, #tpu.memory_space<vmem>>, vector<128x128xbf16>
    %31 = arith.truncf %29 : vector<128x128xf32> to vector<128x128xbf16>
    %cst_7 = arith.constant dense<0.000000e+00> : vector<128x128xf32>
    %32 = tpu.matmul %30, %31, %cst_7 {dimension_numbers = #tpu.dot_dimension_numbers<[1], [0], [0], [1], [0, 0, 1, 1], [], []>} : vector<128x128xbf16>, vector<128x128xbf16>, vector<128x128xf32> -> vector<128x128xf32>
    %c0_8 = arith.constant 0 : index
    %c0_9 = arith.constant 0 : index
    %33 = vector.load %arg5[%c0_8, %c0_9] : memref<128x1xf32, #tpu.memory_space<vmem>>, vector<128x1xf32>
    %34 = vector.broadcast %33 : vector<128x1xf32> to vector<128x128xf32>
    %35 = arith.addf %32, %34 : vector<128x128xf32>
    %cst_10 = arith.constant 0.000000e+00 : f32
    %36 = vector.broadcast %cst_10 : f32 to vector<128x128xf32>
    %37 = arith.maximumf %35, %36 : vector<128x128xf32>
    %c0_11 = arith.constant 0 : index
    %c0_12 = arith.constant 0 : index
    %38 = vector.load %arg6[%c0_11, %c0_12] : memref<128x1xf32, #tpu.memory_space<vmem>>, vector<128x1xf32>
    %39 = vector.broadcast %38 : vector<128x1xf32> to vector<128x128xf32>
    %40 = arith.mulf %37, %39 : vector<128x128xf32>
    %cst_13 = arith.constant dense<0.000000e+00> : vector<128xf32>
    %41 = vector.multi_reduction <add>, %40, %cst_13 [0] : vector<128x128xf32> to vector<128xf32>
    %42 = vector.shape_cast %41 : vector<128xf32> to vector<1x128xf32>
    %c0_14 = arith.constant 0 : index
    %43 = memref.load %arg7[%c0_14] : memref<1xf32, #tpu.memory_space<smem>>
    %44 = vector.broadcast %43 : f32 to vector<1x128xf32>
    %45 = arith.addf %42, %44 : vector<1x128xf32>
    %c0_15 = arith.constant 0 : index
    %c0_16 = arith.constant 0 : index
    %46 = vector.load %arg8[%c0_15, %c0_16] : memref<1x128xf32, #tpu.memory_space<vmem>>, vector<1x128xf32>
    tpu.vector_store %arg8[%c0_15, %c0_16], %45 {strides = array<i32>} : memref<1x128xf32, #tpu.memory_space<vmem>>, vector<1x128xf32>,
    return
  }
  func.func @transform_0(%arg0: i32) -> (i32, i32) {
    %c0_i32 = arith.constant 0 : i32
    %c0_i32_0 = arith.constant 0 : i32
    return %c0_i32, %arg0 : i32, i32
  }
  func.func @transform_1(%arg0: i32) -> (i32, i32) {
    %c0_i32 = arith.constant 0 : i32
    %c0_i32_0 = arith.constant 0 : i32
    %c0_i32_1 = arith.constant 0 : i32
    return %c0_i32, %c0_i32_0 : i32, i32
  }
  func.func @transform_2(%arg0: i32) -> (i32, i32) {
    %c0_i32 = arith.constant 0 : i32
    %c0_i32_0 = arith.constant 0 : i32
    %c0_i32_1 = arith.constant 0 : i32
    return %c0_i32, %c0_i32_0 : i32, i32
  }
  func.func @transform_3(%arg0: i32) -> (i32, i32) {
    %c0_i32 = arith.constant 0 : i32
    %c0_i32_0 = arith.constant 0 : i32
    %c0_i32_1 = arith.constant 0 : i32
    return %c0_i32, %c0_i32_0 : i32, i32
  }
  func.func @transform_4(%arg0: i32) -> (i32, i32) {
    %c0_i32 = arith.constant 0 : i32
    %c0_i32_0 = arith.constant 0 : i32
    %c0_i32_1 = arith.constant 0 : i32
    return %c0_i32, %c0_i32_0 : i32, i32
  }
  func.func @transform_5(%arg0: i32) -> (i32, i32) {
    %c0_i32 = arith.constant 0 : i32
    %c0_i32_0 = arith.constant 0 : i32
    %c0_i32_1 = arith.constant 0 : i32
    return %c0_i32, %c0_i32_0 : i32, i32
  }
  func.func @transform_6(%arg0: i32) -> i32 {
    %c0_i32 = arith.constant 0 : i32
    %c0_i32_0 = arith.constant 0 : i32
    return %c0_i32 : i32
  }
  func.func @transform_7(%arg0: i32) -> (i32, i32) {
    %c0_i32 = arith.constant 0 : i32
    %c0_i32_0 = arith.constant 0 : i32
    return %c0_i32, %arg0 : i32, i32
  }
}

</mosaic_0001>

<bundles_post_ra>
// kernel: critic_forward.1
= control target key start
LH: loop header
LB: loop body
LE: loop exit
PB: predicated region body
PF: predicated region fallthrough
CT: control target
= control target key end

     0   :  { %v1016_v0 = vmov 1   ;;  %v1017_v1 = vmov 0   ;;  %v1018_v13 = vmov 2   ;;  %v1019_v18 = vmov 3   ;;  %s1605_s1 = inlined_call_operand.vmem [shape: f32[128,4], index: 1, kind: input, shape index: {}]   ;;  %s1606_s0 = inlined_call_operand.vmem [shape: f32[4,128], index: 0, kind: input, shape index: {}]   ;;  %s1607_s2 = inlined_call_operand.vmem [shape: f32[128,1], index: 2, kind: input, shape index: {}]   ;;  %s1608_s4 = inlined_call_operand.vmem [shape: f32[128,1], index: 4, kind: input, shape index: {}]   ;;  %s1609_s5 = inlined_call_operand.vmem [shape: f32[128,1], index: 5, kind: input, shape index: {}]   ;;  %s1610_s3 = inlined_call_operand.vmem [shape: bf16[128,128], index: 3, kind: input, shape index: {}]   ;;  %s1611_s6 = inlined_call_operand.<no memory space> [shape: f32[1], index: 6, kind: input, shape index: {}]   ;;  %s1612_s7 = inlined_call_operand.vmem [shape: f32[1,128], index: 7, kind: output, shape index: {}]  }
   0x1   :  { %1006 = vset.pattern.permute.xlu0 %v1016_v0  ;;  %1003 = vset.pattern.permute.xlu2 %v1017_v1  ;;  %v1064_v2 = vld [vmem:[%s1605_s1 + $0x20] sm:$0xff]  ;;  %v1069_v3 = vld [vmem:[%s1605_s1 + $0x10] sm:$0xff]  ;;  %v1078_v4 = vld [vmem:[%s1605_s1 + $0x28] sm:$0xff] }
   0x2   :  { %1002 = vset.pattern.permute.xlu1 %v1017_v1  ;;  %66 = vperm.xlu2 %1003, %v1064_v2   ;;  %v1083_v5 = vld [vmem:[%s1605_s1 + $0x38] sm:$0xff]  ;;  %v1096_v7 = vld [vmem:[%s1605_s1 + $0x40] sm:$0xff]  ;;  %v1101_v8 = vld [vmem:[%s1605_s1 + $0x50] sm:$0xff] }
   0x3   :  { %150 = vperm.xlu0 %1006, %v1069_v3   ;;  %56 = vperm.xlu1 %1002, %v1069_v3   ;;  %v1088_v6 = vld [vmem:[%s1605_s1 + $0x18] sm:$0xff]  ;;  %v1114_v10 = vld [vmem:[%s1605_s1 + $0x68] sm:$0xff]  ;;  %v1122_v11 = vld [vmem:[%s1605_s1 + $0x70] sm:$0xff] }
   0x4   :  { %v1109_v9 = vld [vmem:[%s1605_s1 + $0x58] sm:$0xff]  ;;  %v1127_v12 = vld [vmem:[%s1605_s1] sm:$0xff]  ;;  %v29_v14 = vld [vmem:[%s1605_s1 + $0x8] sm:$0xff] }
   0x5   :  { %v34_v15 = vld [vmem:[%s1605_s1 + $0x30] sm:$0xff]  ;;  %v1148_v16 = vld [vmem:[%s1605_s1 + $0x48] sm:$0xff]  ;;  %v1156_v17 = vld [vmem:[%s1605_s1 + $0x60] sm:$0xff] }
   0x6   :  { %v1163_v19 = vld [vmem:[%s1605_s1 + $0x78] sm:$0xff]  ;;  %v1181_v23 = vld [vmem:[%s1606_s0] sm:$0xf]  ;;  %v434_v59 = vld [vmem:[%s1607_s2 + $0x10] sm:$0xff] }
   0x7   :  { %v1184_v24 = vperm.slane %v1181_v23, 0  ;;  %v1187_v25 = vperm.slane %v1181_v23, 1 }
   0xa   :  { %71 = vperm.xlu2 %1003, %v1078_v4  }
   0xb   :  { %170 = vperm.xlu0 %1006, %v1083_v5   ;;  %61 = vperm.xlu1 %1002, %v1088_v6  }
  0x12   :  { %86 = vperm.xlu2 %1003, %v1096_v7  }
  0x13   :  { %182 = vperm.xlu0 %1006, %v1101_v8   ;;  %81 = vperm.xlu1 %1002, %v1083_v5  }
  0x1a   :  { %101 = vperm.xlu2 %1003, %v1109_v9  }
  0x1b   :  { %194 = vperm.xlu0 %1006, %v1114_v10   ;;  %96 = vperm.xlu1 %1002, %v1101_v8  }
  0x22   :  { %116 = vperm.xlu2 %1003, %v1122_v11  }
  0x23   :  { %1007 = vset.pattern.permute.xlu0 %v1018_v13  ;;  %111 = vperm.xlu1 %1002, %v1114_v10  }
  0x24   :  { %239 = vperm.xlu0 %1007, %v1127_v12  }
  0x2a   :  { %1005 = vset.pattern.permute.xlu2 %v1016_v0 }
  0x2b   :  { %1004 = vset.pattern.permute.xlu1 %v1016_v0  ;;  %146 = vperm.xlu2 %1005, %v29_v14  }
  0x2c   :  { %259 = vperm.xlu0 %1007, %v1078_v4   ;;  %142 = vperm.xlu1 %1004, %v1127_v12  }
  0x33   :  { %158 = vperm.xlu2 %1005, %v1064_v2  }
  0x34   :  { %271 = vperm.xlu0 %1007, %v1096_v7   ;;  %154 = vperm.xlu1 %1004, %v1088_v6  }
  0x3b   :  { %166 = vperm.xlu2 %1005, %v34_v15  }
  0x3c   :  { %283 = vperm.xlu0 %1007, %v1109_v9   ;;  %162 = vperm.xlu1 %1004, %v1078_v4  }
  0x43   :  { %178 = vperm.xlu2 %1005, %v1148_v16  }
  0x44   :  { %295 = vperm.xlu0 %1007, %v1122_v11   ;;  %174 = vperm.xlu1 %1004, %v1096_v7  }
  0x4b   :  { %190 = vperm.xlu2 %1005, %v1156_v17  }
  0x4c   :  { %1011 = vset.pattern.permute.xlu0 %v1019_v18  ;;  %186 = vperm.xlu1 %1004, %v1109_v9  }
  0x4d   :  { %340 = vperm.xlu0 %1011, %v29_v14  }
  0x53   :  { %202 = vperm.xlu2 %1005, %v1163_v19  }
  0x54   :  { %198 = vperm.xlu1 %1004, %v1122_v11  }
  0x55   :  { %360 = vperm.xlu0 %1011, %v34_v15  }
  0x5b   :  { %1009 = vset.pattern.permute.xlu2 %v1018_v13 }
  0x5c   :  { %1008 = vset.pattern.permute.xlu1 %v1018_v13  ;;  %v67_v20 = vpop.permute.xlu2 %66  ;;  %247 = vperm.xlu2 %1009, %v1069_v3  }
  0x5d   :  { %372 = vperm.xlu0 %1011, %v1148_v16   ;;  %243 = vperm.xlu1 %1008, %v29_v14   ;;  %v129_v44 = vmul.f32 %v1184_v24, %v67_v20 }
  0x64   :  { %v1169_v21 = vpop.permute.xlu2 %71  ;;  %255 = vperm.xlu2 %1009, %v1064_v2  }
  0x65   :  { %384 = vperm.xlu0 %1011, %v1156_v17   ;;  %251 = vperm.xlu1 %1008, %v1088_v6  }
  0x6c   :  { %v1174_v22 = vpop.permute.xlu2 %86  ;;  %267 = vperm.xlu2 %1009, %v1083_v5  }
  0x6d   :  { %396 = vperm.xlu0 %1011, %v1163_v19   ;;  %263 = vperm.xlu1 %1008, %v34_v15  }
  0x74   :  { %v1189_v26 = vpop.permute.xlu2 %101  ;;  %279 = vperm.xlu2 %1009, %v1101_v8  }
  0x75   :  { %v151_v27 = vpop.permute.xlu0 %150  ;;  %v57_v28 = vpop.permute.xlu1 %56  ;;  %1013 = vset.pattern.permute.xlu0 %v1017_v1  ;;  %275 = vperm.xlu1 %1008, %v1148_v16  }
  0x76   :  { %v208_v29 = vmul.f32 %v1187_v25, %v151_v27  ;;  %v127_v30 = vmul.f32 %v1184_v24, %v57_v28  ;;  %46 = vperm.xlu0 %1013, %v1127_v12  }
  0x78   :  { %v1197_v31 = vadd.f32 %v208_v29, %v127_v30  ;;  %v447_v30 = vld [vmem:[%s1607_s2 + $0x78] sm:$0xff] }
  0x7c   :  { %v1199_v32 = vpop.permute.xlu2 %116  ;;  %291 = vperm.xlu2 %1009, %v1114_v10  }
  0x7d   :  { %v62_v33 = vpop.permute.xlu1 %61  ;;  %287 = vperm.xlu1 %1008, %v1156_v17   ;;  %v171_v34 = vpop.permute.xlu0 %170 }
  0x7e   :  { %51 = vperm.xlu0 %1013, %v29_v14   ;;  %v213_v35 = vmul.f32 %v1187_v25, %v171_v34  ;;  %v128_v63 = vmul.f32 %v1184_v24, %v62_v33  ;;  %v441_v14 = vld [vmem:[%s1607_s2 + $0x48] sm:$0xff]  ;;  %v446_v33 = vld [vmem:[%s1607_s2 + $0x70] sm:$0xff] }
  0x84   :  { %1010 = vset.pattern.permute.xlu2 %v1019_v18 }
  0x85   :  { %v82_v36 = vpop.permute.xlu1 %81  ;;  %299 = vperm.xlu1 %1008, %v1163_v19   ;;  %v1205_v37 = vpop.permute.xlu2 %146  ;;  %336 = vperm.xlu2 %1010, %v1127_v12  }
  0x86   :  { %v132_v38 = vmul.f32 %v1184_v24, %v82_v36  ;;  %76 = vperm.xlu0 %1013, %v34_v15   ;;  %v183_v39 = vpop.permute.xlu0 %182 }
  0x87   :  { %v216_v41 = vmul.f32 %v1187_v25, %v183_v39 }
  0x88   :  { %v1209_v40 = vadd.f32 %v213_v35, %v132_v38 }
  0x8d   :  { %v97_v42 = vpop.permute.xlu1 %96  ;;  %1012 = vset.pattern.permute.xlu1 %v1019_v18  ;;  %v159_v43 = vpop.permute.xlu2 %158  ;;  %348 = vperm.xlu2 %1010, %v1088_v6  }
  0x8e   :  { %v135_v45 = vmul.f32 %v1184_v24, %v97_v42  ;;  %v210_v46 = vmul.f32 %v1187_v25, %v159_v43  ;;  %91 = vperm.xlu0 %1013, %v1148_v16   ;;  %344 = vperm.xlu1 %1012, %v1069_v3   ;;  %v195_v47 = vpop.permute.xlu0 %194  ;;  %v1252_v3 = vperm.slane %v1181_v23, 2  ;;  %v133_v16 = vmul.f32 %v1184_v24, %v1174_v22  ;;  %v436_v22 = vld [vmem:[%s1607_s2 + $0x20] sm:$0xff] }
  0x8f   :  { %v219_v50 = vmul.f32 %v1187_v25, %v195_v47 }
  0x90   :  { %v1218_v48 = vadd.f32 %v216_v41, %v135_v45  ;;  %v1220_v49 = vadd.f32 %v210_v46, %v129_v44  ;;  %v584_v44 = vld [vmem:[%s1608_s4] sm:$0xff] }
  0x91   :  { %v444_v46 = vld [vmem:[%s1607_s2 + $0x60] sm:$0xff] }
  0x95   :  { %v112_v51 = vpop.permute.xlu1 %111  ;;  %v1223_v52 = vpop.permute.xlu2 %166  ;;  %356 = vperm.xlu2 %1010, %v1078_v4   ;;  %v442_v4 = vld [vmem:[%s1607_s2 + $0x50] sm:$0xff] }
  0x96   :  { %v138_v53 = vmul.f32 %v1184_v24, %v112_v51  ;;  %106 = vperm.xlu0 %1013, %v1156_v17   ;;  %352 = vperm.xlu1 %1012, %v1064_v2   ;;  %v1229_v54 = vpop.permute.xlu0 %239 }
  0x98   :  { %v1231_v55 = vadd.f32 %v219_v50, %v138_v53 }
  0x9d   :  { %v1233_v56 = vpop.permute.xlu2 %178  ;;  %368 = vperm.xlu2 %1010, %v1096_v7  }
  0x9e   :  { %121 = vperm.xlu0 %1013, %v1163_v19   ;;  %364 = vperm.xlu1 %1012, %v1083_v5   ;;  %v1238_v57 = vpop.permute.xlu1 %142  ;;  %v260_v58 = vpop.permute.xlu0 %259 }
  0xa5   :  { %v1243_v60 = vpop.permute.xlu2 %190  ;;  %380 = vperm.xlu2 %1010, %v1109_v9   ;;  %v308_v9 = vmul.f32 %v1252_v3, %v260_v58 }
  0xa6   :  { %460 = vperm.xlu0 %1013, %v434_v59   ;;  %376 = vperm.xlu1 %1012, %v1101_v8   ;;  %v155_v61 = vpop.permute.xlu1 %154  ;;  %v272_v62 = vpop.permute.xlu0 %271  ;;  %v130_v8 = vmul.f32 %v1184_v24, %v1169_v21 }
  0xa7   :  { %v209_v0 = vmul.f32 %v1187_v25, %v155_v61  ;;  %v311_v19 = vmul.f32 %v1252_v3, %v272_v62 }
  0xa9   :  { %v1249_v2 = vadd.f32 %v209_v0, %v128_v63  ;;  %v587_v63 = vld [vmem:[%s1608_s4 + $0x18] sm:$0xff] }
  0xad   :  { %v1257_v5 = vpop.permute.xlu2 %202  ;;  %392 = vperm.xlu2 %1010, %v1122_v11   ;;  %v432_v11 = vld [vmem:[%s1607_s2] sm:$0xff] }
  0xae   :  { %500 = vperm.xlu0 %1013, %v442_v4   ;;  %388 = vperm.xlu1 %1012, %v1114_v10   ;;  %v163_v6 = vpop.permute.xlu1 %162  ;;  %v284_v7 = vpop.permute.xlu0 %283  ;;  %v433_v10 = vld [vmem:[%s1607_s2 + $0x8] sm:$0xff]  ;;  %v443_v4 = vld [vmem:[%s1607_s2 + $0x58] sm:$0xff] }
  0xaf   :  { %v211_v12 = vmul.f32 %v1187_v25, %v163_v6  ;;  %v314_v41 = vmul.f32 %v1252_v3, %v284_v7 }
  0xb1   :  { %v227_v13 = vadd.f32 %v211_v12, %v130_v8  ;;  %v590_v12 = vld [vmem:[%s1608_s4 + $0x30] sm:$0xff] }
  0xb3   :  { %v1268_v15 = vadd.f32 %v308_v9, %v227_v13  ;;  %v439_v13 = vld [vmem:[%s1607_s2 + $0x38] sm:$0xff] }
  0xb5   :  { %1015 = vset.pattern.permute.xlu2 %v1017_v1 }
  0xb6   :  { %495 = vperm.xlu0 %1013, %v441_v14   ;;  %1014 = vset.pattern.permute.xlu1 %v1017_v1  ;;  %v175_v17 = vpop.permute.xlu1 %174  ;;  %v248_v18 = vpop.permute.xlu2 %247  ;;  %v438_v14 = vld [vmem:[%s1607_s2 + $0x30] sm:$0xff] }
  0xb7   :  { %v214_v20 = vmul.f32 %v1187_v25, %v175_v17  ;;  %v305_v21 = vmul.f32 %v1252_v3, %v248_v18  ;;  %455 = vperm.xlu2 %1015, %v433_v10   ;;  %v296_v27 = vpop.permute.xlu0 %295  ;;  %450 = vperm.xlu1 %1014, %v432_v11  }
  0xb8   :  { %v317_v59 = vmul.f32 %v1252_v3, %v296_v27  ;;  %v437_v27 = vld [vmem:[%s1607_s2 + $0x28] sm:$0xff] }
  0xb9   :  { %v230_v28 = vadd.f32 %v214_v20, %v133_v16  ;;  %v1284_v29 = vadd.f32 %v305_v21, %v1197_v31  ;;  %v136_v31 = vmul.f32 %v1184_v24, %v1189_v26  ;;  %v445_v26 = vld [vmem:[%s1607_s2 + $0x68] sm:$0xff]  ;;  %v435_v21 = vld [vmem:[%s1607_s2 + $0x18] sm:$0xff] }
  0xba   :  { %v593_v20 = vld [vmem:[%s1608_s4 + $0x48] sm:$0xff] }
  0xbb   :  { %v1289_v1 = vadd.f32 %v311_v19, %v230_v28 }
  0xbe   :  { %470 = vperm.xlu0 %1013, %v436_v22   ;;  %v187_v34 = vpop.permute.xlu1 %186  ;;  %v256_v35 = vpop.permute.xlu2 %255 }
  0xbf   :  { %v217_v36 = vmul.f32 %v1187_v25, %v187_v34  ;;  %v307_v38 = vmul.f32 %v1252_v3, %v256_v35  ;;  %525 = vperm.xlu2 %1015, %v447_v30   ;;  %520 = vperm.xlu1 %1014, %v446_v33   ;;  %v1301_v39 = vpop.permute.xlu0 %340  ;;  %v586_v30 = vld [vmem:[%s1608_s4 + $0x10] sm:$0xff]  ;;  %v585_v33 = vld [vmem:[%s1608_s4 + $0x8] sm:$0xff]  ;;  %v1383_v34 = vperm.slane %v1181_v23, 3 }
  0xc1   :  { %v233_v42 = vadd.f32 %v217_v36, %v136_v31  ;;  %v1305_v43 = vadd.f32 %v307_v38, %v1220_v49  ;;  %v139_v49 = vmul.f32 %v1184_v24, %v1199_v32  ;;  %v440_v32 = vld [vmem:[%s1607_s2 + $0x40] sm:$0xff] }
  0xc3   :  { %v1310_v45 = vadd.f32 %v314_v41, %v233_v42  ;;  %v206_v41 = vmul.f32 %v1187_v25, %v1238_v57  ;;  %v588_v57 = vld [vmem:[%s1608_s4 + $0x20] sm:$0xff] }
  0xc6   :  { %602 = vperm.xlu0 %1013, %v584_v44   ;;  %v199_v47 = vpop.permute.xlu1 %198  ;;  %v268_v50 = vpop.permute.xlu2 %267 }
  0xc7   :  { %v220_v51 = vmul.f32 %v1187_v25, %v199_v47  ;;  %v310_v53 = vmul.f32 %v1252_v3, %v268_v50  ;;  %515 = vperm.xlu2 %1015, %v445_v26   ;;  %510 = vperm.xlu1 %1014, %v444_v46   ;;  %v1322_v58 = vpop.permute.xlu0 %360  ;;  %v303_v26 = vmul.f32 %v1252_v3, %v1229_v54  ;;  %v599_v47 = vld [vmem:[%s1608_s4 + $0x78] sm:$0xff]  ;;  %v589_v50 = vld [vmem:[%s1608_s4 + $0x28] sm:$0xff] }
  0xc9   :  { %v236_v61 = vadd.f32 %v220_v51, %v139_v49  ;;  %v1326_v62 = vadd.f32 %v310_v53, %v1209_v40 }
  0xcb   :  { %v1331_v0 = vadd.f32 %v317_v59, %v236_v61 }
  0xce   :  { %617 = vperm.xlu0 %1013, %v587_v63   ;;  %v280_v6 = vpop.permute.xlu2 %279  ;;  %v207_v63 = vmul.f32 %v1187_v25, %v1205_v37  ;;  %v591_v37 = vld [vmem:[%s1608_s4 + $0x38] sm:$0xff] }
  0xcf   :  { %v313_v7 = vmul.f32 %v1252_v3, %v280_v6  ;;  %490 = vperm.xlu2 %1015, %v440_v32   ;;  %505 = vperm.xlu1 %1014, %v443_v4   ;;  %v244_v40 = vpop.permute.xlu1 %243  ;;  %v1340_v8 = vpop.permute.xlu0 %372 }
  0xd0   :  { %v304_v6 = vmul.f32 %v1252_v3, %v244_v40 }
  0xd1   :  { %v1343_v9 = vadd.f32 %v313_v7, %v1218_v48 }
  0xd6   :  { %632 = vperm.xlu0 %1013, %v590_v12   ;;  %v292_v10 = vpop.permute.xlu2 %291  ;;  %v795_v12 = vld [vmem:[%s1609_s5 + $0x10] sm:$0xff] }
  0xd7   :  { %v316_v11 = vmul.f32 %v1252_v3, %v292_v10  ;;  %485 = vperm.xlu2 %1015, %v439_v13   ;;  %480 = vperm.xlu1 %1014, %v438_v14   ;;  %v252_v48 = vpop.permute.xlu1 %251  ;;  %v1355_v16 = vpop.permute.xlu0 %384  ;;  %v592_v13 = vld [vmem:[%s1608_s4 + $0x40] sm:$0xff]  ;;  %v401_v14 = vmul.f32 %v1383_v34, %v1301_v39  ;;  %v798_v39 = vld [vmem:[%s1609_s5 + $0x28] sm:$0xff] }
  0xd8   :  { %v306_v17 = vmul.f32 %v1252_v3, %v252_v48 }
  0xd9   :  { %v1359_v18 = vadd.f32 %v316_v11, %v1231_v55 }
  0xda   :  { %v322_v19 = vadd.f32 %v306_v17, %v1249_v2  ;;  %v596_v2 = vld [vmem:[%s1608_s4 + $0x60] sm:$0xff]  ;;  %v212_v17 = vmul.f32 %v1187_v25, %v1223_v52  ;;  %v406_v52 = vmul.f32 %v1383_v34, %v1322_v58 }
  0xde   :  { %647 = vperm.xlu0 %1013, %v593_v20  }
  0xdf   :  { %465 = vperm.xlu2 %1015, %v435_v21   ;;  %475 = vperm.xlu1 %1014, %v437_v27   ;;  %v264_v28 = vpop.permute.xlu1 %263  ;;  %v337_v55 = vpop.permute.xlu2 %336  ;;  %v595_v27 = vld [vmem:[%s1608_s4 + $0x58] sm:$0xff] }
  0xe0   :  { %v1371_v22 = vpop.permute.xlu0 %396  ;;  %v400_v23 = vmul.f32 %v1383_v34, %v337_v55  ;;  %v309_v20 = vmul.f32 %v1252_v3, %v264_v28  ;;  %v594_v55 = vld [vmem:[%s1608_s4 + $0x50] sm:$0xff] }
  0xe6   :  { %662 = vperm.xlu0 %1013, %v596_v2  }
  0xe7   :  { %612 = vperm.xlu2 %1015, %v586_v30   ;;  %607 = vperm.xlu1 %1014, %v585_v33   ;;  %v276_v35 = vpop.permute.xlu1 %275  ;;  %v349_v31 = vpop.permute.xlu2 %348 }
  0xe8   :  { %v403_v36 = vmul.f32 %v1383_v34, %v349_v31  ;;  %v47_v38 = vpop.permute.xlu0 %46 }
  0xe9   :  { %v125_v42 = vmul.f32 %v1184_v24, %v47_v38 }
  0xea   :  { %v1389_v44 = vadd.f32 %v403_v36, %v322_v19  ;;  %v215_v36 = vmul.f32 %v1187_v25, %v1233_v56  ;;  %v597_v56 = vld [vmem:[%s1608_s4 + $0x68] sm:$0xff] }
  0xeb   :  { %v222_v46 = vadd.f32 %v206_v41, %v125_v42  ;;  %v312_v42 = vmul.f32 %v1252_v3, %v276_v35 }
  0xed   :  { %v319_v49 = vadd.f32 %v303_v26, %v222_v46  ;;  %v801_v26 = vld [vmem:[%s1609_s5 + $0x40] sm:$0xff]  ;;  %v598_v46 = vld [vmem:[%s1608_s4 + $0x70] sm:$0xff] }
  0xee   :  { %677 = vperm.xlu0 %1013, %v599_v47   ;;  %v409_v47 = vmul.f32 %v1383_v34, %v1340_v8  ;;  %v804_v8 = vld [vmem:[%s1609_s5 + $0x58] sm:$0xff] }
  0xef   :  { %627 = vperm.xlu2 %1015, %v589_v50   ;;  %622 = vperm.xlu1 %1014, %v588_v57   ;;  %v288_v54 = vpop.permute.xlu1 %287  ;;  %v357_v51 = vpop.permute.xlu2 %356  ;;  %v1403_v53 = vadd.f32 %v400_v23, %v319_v49 }
  0xf0   :  { %v405_v59 = vmul.f32 %v1383_v34, %v357_v51  ;;  %v52_v61 = vpop.permute.xlu0 %51  ;;  %v218_v51 = vmul.f32 %v1187_v25, %v1243_v60  ;;  %v793_v60 = vld [vmem:[%s1609_s5] sm:$0xff] }
  0xf1   :  { %v126_v32 = vmul.f32 %v1184_v24, %v52_v61 }
  0xf2   :  { %v1410_v4 = vadd.f32 %v405_v59, %v1268_v15 }
  0xf3   :  { %v223_v7 = vadd.f32 %v207_v63, %v126_v32  ;;  %v315_v63 = vmul.f32 %v1252_v3, %v288_v54 }
  0xf5   :  { %v320_v15 = vadd.f32 %v304_v6, %v223_v7  ;;  %v794_v7 = vld [vmem:[%s1609_s5 + $0x8] sm:$0xff] }
  0xf6   :  { %821 = vperm.xlu0 %1013, %v795_v12   ;;  %v412_v12 = vmul.f32 %v1383_v34, %v1355_v16  ;;  %v796_v16 = vld [vmem:[%s1609_s5 + $0x18] sm:$0xff] }
  0xf7   :  { %642 = vperm.xlu2 %1015, %v592_v13   ;;  %637 = vperm.xlu1 %1014, %v591_v37   ;;  %v1424_v40 = vpop.permute.xlu1 %299  ;;  %v1426_v10 = vpop.permute.xlu2 %368  ;;  %v1428_v11 = vadd.f32 %v401_v14, %v320_v15  ;;  %v807_v15 = vld [vmem:[%s1609_s5 + $0x70] sm:$0xff] }
  0xf8   :  { %v77_v48 = vpop.permute.xlu0 %76 }
  0xf9   :  { %v131_v19 = vmul.f32 %v1184_v24, %v77_v48  ;;  %v797_v48 = vld [vmem:[%s1609_s5 + $0x20] sm:$0xff] }
  0xfb   :  { %v228_v21 = vadd.f32 %v212_v17, %v131_v19 }
  0xfd   :  { %v325_v2 = vadd.f32 %v309_v20, %v228_v21  ;;  %v800_v21 = vld [vmem:[%s1609_s5 + $0x38] sm:$0xff] }
  0xfe   :  { %836 = vperm.xlu0 %1013, %v798_v39   ;;  %v799_v39 = vld [vmem:[%s1609_s5 + $0x30] sm:$0xff] }
  0xff   :  { %657 = vperm.xlu2 %1015, %v595_v27   ;;  %652 = vperm.xlu1 %1014, %v594_v55   ;;  %v1445_v28 = vpop.permute.xlu2 %380  ;;  %v1447_v30 = vadd.f32 %v406_v52, %v325_v2 }
 0x100   :  { %v92_v33 = vpop.permute.xlu0 %91  ;;  %v345_v31 = vpop.permute.xlu1 %344 }
 0x101   :  { %v134_v38 = vmul.f32 %v1184_v24, %v92_v33  ;;  %v402_v41 = vmul.f32 %v1383_v34, %v345_v31  ;;  %v221_v33 = vmul.f32 %v1187_v25, %v1257_v5  ;;  %v408_v31 = vmul.f32 %v1383_v34, %v1426_v10 }
 0x103   :  { %v231_v58 = vadd.f32 %v215_v36, %v134_v38  ;;  %v1458_v23 = vadd.f32 %v402_v41, %v1284_v29  ;;  %v803_v38 = vld [vmem:[%s1609_s5 + $0x50] sm:$0xff]  ;;  %v802_v41 = vld [vmem:[%s1609_s5 + $0x48] sm:$0xff]  ;;  %v424_v10 = vadd.f32 %v408_v31, %v1289_v1 }
 0x104   :  { %v806_v1 = vld [vmem:[%s1609_s5 + $0x68] sm:$0xff] }
 0x105   :  { %v328_v35 = vadd.f32 %v312_v42, %v231_v58 }
 0x106   :  { %851 = vperm.xlu0 %1013, %v801_v26  }
 0x107   :  { %672 = vperm.xlu2 %1015, %v598_v46   ;;  %667 = vperm.xlu1 %1014, %v597_v56   ;;  %v393_v50 = vpop.permute.xlu2 %392  ;;  %v425_v57 = vadd.f32 %v409_v47, %v328_v35  ;;  %v415_v56 = vmul.f32 %v1383_v34, %v1371_v22 }
 0x108   :  { %v107_v49 = vpop.permute.xlu0 %106  ;;  %v353_v29 = vpop.permute.xlu1 %352 }
 0x109   :  { %v137_v59 = vmul.f32 %v1184_v24, %v107_v49  ;;  %v404_v61 = vmul.f32 %v1383_v34, %v353_v29  ;;  %v414_v49 = vmul.f32 %v1383_v34, %v393_v50 }
 0x10b   :  { %v234_v32 = vadd.f32 %v218_v51, %v137_v59  ;;  %v1477_v6 = vadd.f32 %v404_v61, %v1305_v43  ;;  %v430_v61 = vadd.f32 %v414_v49, %v1331_v0  ;;  %v971_v49 = vld [vmem:[%s1610_s3 + $0x28] sm:$0xff] }
 0x10d   :  { %v331_v54 = vadd.f32 %v315_v63, %v234_v32 }
 0x10e   :  { %866 = vperm.xlu0 %1013, %v804_v8  }
 0x10f   :  { %816 = vperm.xlu2 %1015, %v794_v7   ;;  %811 = vperm.xlu1 %1014, %v793_v60   ;;  %v1487_v13 = vadd.f32 %v412_v12, %v331_v54  ;;  %v808_v54 = vld [vmem:[%s1609_s5 + $0x78] sm:$0xff] }
 0x110   :  { %v122_v37 = vpop.permute.xlu0 %121  ;;  %v1489_v43 = vpop.permute.xlu1 %364 }
 0x111   :  { %v456_v14 = vpop.permute.xlu2 %455  ;;  %v140_v27 = vmul.f32 %v1184_v24, %v122_v37  ;;  %v318_v24 = vmul.f32 %v1252_v3, %v1424_v40 }
 0x112   :  { %v529_v42 = vadd.f32 %v456_v14, %v1428_v11 }
 0x113   :  { %v237_v36 = vadd.f32 %v221_v33, %v140_v27 }
 0x114   :  { %v545_v40 = vmax.f32 %v529_v42, 0.0 }
 0x115   :  { %v334_v25 = vadd.f32 %v318_v24, %v237_v36 }
 0x116   :  { %881 = vperm.xlu0 %1013, %v807_v15  }
 0x117   :  { %831 = vperm.xlu2 %1015, %v797_v48   ;;  %826 = vperm.xlu1 %1014, %v796_v16   ;;  %v431_v29 = vadd.f32 %v415_v56, %v334_v25  ;;  %v972_v56 = vld [vmem:[%s1610_s3 + $0x30] sm:$0xff] }
 0x118   :  { %v461_v17 = vpop.permute.xlu0 %460  ;;  %v377_v19 = vpop.permute.xlu1 %376 }
 0x119   :  { %v526_v20 = vpop.permute.xlu2 %525  ;;  %v530_v14 = vadd.f32 %v461_v17, %v1458_v23  ;;  %v410_v16 = vmul.f32 %v1383_v34, %v377_v19 }
 0x11b   :  { %v426_v17 = vadd.f32 %v410_v16, %v1343_v9 }
 0x11f   :  { %846 = vperm.xlu2 %1015, %v800_v21   ;;  %841 = vperm.xlu1 %1014, %v799_v39   ;;  %v411_v21 = vmul.f32 %v1383_v34, %v1445_v28  ;;  %v546_v39 = vmax.f32 %v530_v14, 0.0  ;;  %v407_v28 = vmul.f32 %v1383_v34, %v1489_v43 }
 0x120   :  { %v1507_v55 = vpop.permute.xlu0 %500  ;;  %v389_v52 = vpop.permute.xlu1 %388 }
 0x121   :  { %v516_v2 = vpop.permute.xlu2 %515  ;;  %v413_v50 = vmul.f32 %v1383_v34, %v389_v52  ;;  %v538_v31 = vadd.f32 %v1507_v55, %v426_v17  ;;  %v427_v19 = vadd.f32 %v411_v21, %v1310_v45 }
 0x123   :  { %v429_v60 = vadd.f32 %v413_v50, %v1359_v18  ;;  %v554_v36 = vmax.f32 %v538_v31, 0.0 }
 0x125   :  { %v541_v15 = vadd.f32 %v516_v2, %v429_v60 }
 0x127   :  { %861 = vperm.xlu2 %1015, %v803_v38   ;;  %856 = vperm.xlu1 %1014, %v802_v41   ;;  %v557_v27 = vmax.f32 %v541_v15, 0.0  ;;  %v423_v41 = vadd.f32 %v407_v28, %v1326_v62 }
 0x128   :  { %v496_v5 = vpop.permute.xlu0 %495 }
 0x129   :  { %v537_v58 = vadd.f32 %v496_v5, %v425_v57  ;;  %v491_v26 = vpop.permute.xlu2 %490  ;;  %v451_v46 = vpop.permute.xlu1 %450  ;;  %v805_v57 = vld [vmem:[%s1609_s5 + $0x60] sm:$0xff] }
 0x12a   :  { %v536_v47 = vadd.f32 %v491_v26, %v424_v10  ;;  %v528_v35 = vadd.f32 %v451_v46, %v1403_v53  ;;  %v543_v53 = vadd.f32 %v526_v20, %v431_v29  ;;  %v968_v46 = vld [vmem:[%s1610_s3 + $0x10] sm:$0xff] }
 0x12b   :  { %v553_v3 = vmax.f32 %v537_v58, 0.0 }
 0x12c   :  { %v552_v51 = vmax.f32 %v536_v47, 0.0  ;;  %v544_v11 = vmax.f32 %v528_v35, 0.0  ;;  %v559_v7 = vmax.f32 %v543_v53, 0.0  ;;  %v967_v47 = vld [vmem:[%s1610_s3 + $0x8] sm:$0xff]  ;;  %v969_v35 = vld [vmem:[%s1610_s3 + $0x18] sm:$0xff] }
 0x12e   :  { %v580_v59 = vpack.c.bf16 %v553_v3, %v552_v51  ;;  %v1533_v22 = vpack.c.bf16 %v545_v40, %v544_v11  ;;  %v973_v3 = vld [vmem:[%s1610_s3 + $0x38] sm:$0xff] }
 0x12f   :  { %876 = vperm.xlu2 %1015, %v806_v1   ;;  %871 = vperm.xlu1 %1014, %v805_v57  }
 0x130   :  { %v471_v5 = vpop.permute.xlu0 %470 }
 0x131   :  { %v486_v63 = vpop.permute.xlu2 %485  ;;  %v521_v32 = vpop.permute.xlu1 %520  ;;  %v532_v43 = vadd.f32 %v471_v5, %v1477_v6  ;;  %v966_v6 = vld [vmem:[%s1610_s3] sm:$0xff] }
 0x132   :  { %v542_v8 = vadd.f32 %v521_v32, %v430_v61  ;;  %v535_v24 = vadd.f32 %v486_v63, %v423_v41 }
 0x133   :  { %v548_v58 = vmax.f32 %v532_v43, 0.0 }
 0x134   :  { %v558_v12 = vmax.f32 %v542_v8, 0.0  ;;  %v551_v42 = vmax.f32 %v535_v24, 0.0 }
 0x136   :  { %v583_v37 = vpack.c.bf16 %v559_v7, %v558_v12 }
 0x137   :  { %886 = vperm.xlu1 %1014, %v808_v54  }
 0x138   :  { %728 = vmatpush.bf16.msra.mxu0 %v583_v37  ;;  %974 = vmatpush.bf16.msra.mxu1 %v583_v37  ;;  %v603_v40 = vpop.permute.xlu0 %602 }
 0x139   :  { %975 = vmatpush.bf16.msra.mxu2 %v583_v37  ;;  %976 = vmatpush.bf16.msra.mxu3 %v583_v37  ;;  %v466_v0 = vpop.permute.xlu2 %465  ;;  %v511_v48 = vpop.permute.xlu1 %510 }
 0x13a   :  { %v531_v18 = vadd.f32 %v466_v0, %v1389_v44  ;;  %v540_v20 = vadd.f32 %v511_v48, %v1487_v13 }
 0x13c   :  { %v547_v52 = vmax.f32 %v531_v18, 0.0  ;;  %v556_v23 = vmax.f32 %v540_v20, 0.0 }
 0x13e   :  { %v577_v2 = vpack.c.bf16 %v547_v52, %v546_v39  ;;  %v582_v33 = vpack.c.bf16 %v557_v27, %v556_v23 }
 0x140   :  { %729 = vmatpush.bf16.msra.mxu0 %v582_v33  ;;  %977 = vmatpush.bf16.msra.mxu1 %v582_v33  ;;  %v618_v11 = vpop.permute.xlu0 %617 }
 0x141   :  { %978 = vmatpush.bf16.msra.mxu2 %v582_v33  ;;  %979 = vmatpush.bf16.msra.mxu3 %v582_v33  ;;  %v506_v44 = vpop.permute.xlu1 %505  ;;  %v613_v51 = vpop.permute.xlu2 %612 }
 0x142   :  { %v539_v13 = vadd.f32 %v506_v44, %v427_v19 }
 0x144   :  { %v555_v38 = vmax.f32 %v539_v13, 0.0 }
 0x146   :  { %v581_v9 = vpack.c.bf16 %v555_v38, %v554_v36 }
 0x148   :  { %730 = vmatpush.bf16.msra.mxu0 %v581_v9  ;;  %980 = vmatpush.bf16.msra.mxu1 %v581_v9 }
 0x149   :  { %981 = vmatpush.bf16.msra.mxu2 %v581_v9  ;;  %982 = vmatpush.bf16.msra.mxu3 %v581_v9  ;;  %v481_v55 = vpop.permute.xlu1 %480  ;;  %v628_v57 = vpop.permute.xlu2 %627 }
 0x14a   :  { %v534_v45 = vadd.f32 %v481_v55, %v1447_v30 }
 0x14c   :  { %v550_v25 = vmax.f32 %v534_v45, 0.0  ;;  %731 = vmatpush.bf16.msra.mxu0 %v580_v59  ;;  %983 = vmatpush.bf16.msra.mxu1 %v580_v59 }
 0x14d   :  { %984 = vmatpush.bf16.msra.mxu2 %v580_v59  ;;  %985 = vmatpush.bf16.msra.mxu3 %v580_v59  ;;  %v633_v59 = vpop.permute.xlu0 %632 }
 0x14e   :  { %v579_v34 = vpack.c.bf16 %v551_v42, %v550_v25 }
 0x150   :  { %732 = vmatpush.bf16.msra.mxu0 %v579_v34  ;;  %986 = vmatpush.bf16.msra.mxu1 %v579_v34 }
 0x151   :  { %987 = vmatpush.bf16.msra.mxu2 %v579_v34  ;;  %988 = vmatpush.bf16.msra.mxu3 %v579_v34  ;;  %v476_v62 = vpop.permute.xlu1 %475  ;;  %v643_v53 = vpop.permute.xlu2 %642 }
 0x152   :  { %v533_v10 = vadd.f32 %v476_v62, %v1410_v4  ;;  %v970_v4 = vld [vmem:[%s1610_s3 + $0x20] sm:$0xff] }
 0x154   :  { %v549_v26 = vmax.f32 %v533_v10, 0.0 }
 0x155   :  { %v648_v50 = vpop.permute.xlu0 %647 }
 0x156   :  { %v578_v30 = vpack.c.bf16 %v549_v26, %v548_v58 }
 0x158   :  { %733 = vmatpush.bf16.msra.mxu0 %v578_v30  ;;  %989 = vmatpush.bf16.msra.mxu1 %v578_v30 }
 0x159   :  { %990 = vmatpush.bf16.msra.mxu2 %v578_v30  ;;  %991 = vmatpush.bf16.msra.mxu3 %v578_v30  ;;  %v608_v29 = vpop.permute.xlu1 %607  ;;  %v1584_v63 = vpop.permute.xlu2 %657 }
 0x15c   :  { %734 = vmatpush.bf16.msra.mxu0 %v577_v2  ;;  %992 = vmatpush.bf16.msra.mxu1 %v577_v2 }
 0x15d   :  { %993 = vmatpush.bf16.msra.mxu2 %v577_v2  ;;  %994 = vmatpush.bf16.msra.mxu3 %v577_v2  ;;  %v1586_v32 = vpop.permute.xlu0 %662 }
 0x160   :  { %735 = vmatpush.bf16.msra.mxu0 %v1533_v22  ;;  %995 = vmatpush.bf16.msra.mxu1 %v1533_v22 }
 0x161   :  { %996 = vmatpush.bf16.msra.mxu2 %v1533_v22  ;;  %997 = vmatpush.bf16.msra.mxu3 %v1533_v22  ;;  %v623_v1 = vpop.permute.xlu1 %622  ;;  %v1590_v7 = vpop.permute.xlu2 %672 }
 0x163   :  { %736 = vmatmul.bf16.vlgmr.msra.gmra.mxu0 %v966_v6  ;;  %746 = vmatmul.bf16.vlgmr.msra.gmra.mxu1 %v968_v46 }
 0x164   :  { %756 = vmatmul.bf16.vlgmr.msra.gmra.mxu2 %v970_v4  ;;  %766 = vmatmul.bf16.vlgmr.msra.gmra.mxu3 %v972_v56 }
 0x165   :  { %v1592_v60 = vpop.permute.xlu0 %677 }
 0x169   :  { %v638_v22 = vpop.permute.xlu1 %637  ;;  %v817_v14 = vpop.permute.xlu2 %816 }
 0x16d   :  { %v822_v16 = vpop.permute.xlu0 %821 }
 0x171   :  { %v653_v61 = vpop.permute.xlu1 %652  ;;  %v832_v2 = vpop.permute.xlu2 %831 }
 0x173   :  { %741 = vmatmul.bf16.gmra.mxu0 %v967_v47  ;;  %751 = vmatmul.bf16.gmra.mxu1 %v969_v35 }
 0x174   :  { %761 = vmatmul.bf16.gmra.mxu2 %v971_v49  ;;  %771 = vmatmul.bf16.gmra.mxu3 %v973_v3 }
 0x175   :  { %v837_v31 = vpop.permute.xlu0 %836 }
 0x179   :  { %v1588_v8 = vpop.permute.xlu1 %667  ;;  %v847_v10 = vpop.permute.xlu2 %846 }
 0x17d   :  { %v852_v46 = vpop.permute.xlu0 %851 }
 0x181   :  { %v812_v37 = vpop.permute.xlu1 %811 }
 0x189   :  { %v827_v18 = vpop.permute.xlu1 %826 }
 0x191   :  { %v842_v28 = vpop.permute.xlu1 %841 }
 0x199   :  { %v857_v49 = vpop.permute.xlu1 %856 }
 0x1e0   :  { %v737_v12 = vpop.f32.mrf.mxu0  ;;  %v747_v54 = vpop.f32.mrf.mxu1 }
 0x1e1   :  { %v738_v23 = vadd.f32 %v737_v12, %v603_v40  ;;  %v748_v36 = vadd.f32 %v747_v54, %v623_v1 }
 0x1e3   :  { %v777_v19 = vmax.f32 %v738_v23, 0.0  ;;  %v781_v5 = vmax.f32 %v748_v36, 0.0  ;;  %v872_v23 = vpop.permute.xlu1 %871 }
 0x1e5   :  { %v889_v24 = vmul.f32 %v812_v37, %v777_v19  ;;  %v893_v4 = vmul.f32 %v832_v2, %v781_v5 }
 0x1e7   :  { %v757_v15 = vpop.f32.mrf.mxu2  ;;  %v767_v20 = vpop.f32.mrf.mxu3 }
 0x1e8   :  { %v739_v0 = vpop.f32.mrf.mxu0  ;;  %v749_v48 = vpop.f32.mrf.mxu1  ;;  %v758_v56 = vadd.f32 %v757_v15, %v643_v53  ;;  %v768_v15 = vadd.f32 %v767_v20, %v1586_v32 }
 0x1e9   :  { %v740_v21 = vadd.f32 %v739_v0, %v608_v29  ;;  %v750_v55 = vadd.f32 %v749_v48, %v628_v57  ;;  %v862_v48 = vpop.permute.xlu2 %861 }
 0x1ea   :  { %v785_v57 = vmax.f32 %v758_v56, 0.0 }
 0x1eb   :  { %v778_v33 = vmax.f32 %v740_v21, 0.0  ;;  %v782_v58 = vmax.f32 %v750_v55, 0.0  ;;  %v867_v21 = vpop.permute.xlu0 %866 }
 0x1ec   :  { %v897_v53 = vmul.f32 %v852_v46, %v785_v57 }
 0x1ed   :  { %v890_v38 = vmul.f32 %v817_v14, %v778_v33  ;;  %v894_v40 = vmul.f32 %v837_v31, %v782_v58 }
 0x1ef   :  { %v759_v39 = vpop.f32.mrf.mxu2  ;;  %v769_v13 = vpop.f32.mrf.mxu3  ;;  %v905_v34 = vadd.f32 %v890_v38, %v889_v24 }
 0x1f0   :  { %v742_v27 = vpop.f32.mrf.mxu0  ;;  %v752_v52 = vpop.f32.mrf.mxu1  ;;  %v760_v29 = vadd.f32 %v759_v39, %v648_v50  ;;  %v770_v39 = vadd.f32 %v769_v13, %v1588_v8 }
 0x1f1   :  { %v743_v17 = vadd.f32 %v742_v27, %v613_v51  ;;  %v753_v43 = vadd.f32 %v752_v52, %v633_v59  ;;  %v877_v38 = vpop.permute.xlu2 %876 }
 0x1f2   :  { %v786_v37 = vmax.f32 %v760_v29, 0.0 }
 0x1f3   :  { %v779_v44 = vmax.f32 %v743_v17, 0.0  ;;  %v783_v47 = vmax.f32 %v753_v43, 0.0  ;;  %v789_v17 = vmax.f32 %v768_v15, 0.0 }
 0x1f4   :  { %v898_v50 = vmul.f32 %v857_v49, %v786_v37 }
 0x1f5   :  { %v891_v45 = vmul.f32 %v822_v16, %v779_v44  ;;  %v895_v59 = vmul.f32 %v842_v28, %v783_v47  ;;  %v901_v20 = vmul.f32 %v872_v23, %v789_v17 }
 0x1f7   :  { %v762_v41 = vpop.f32.mrf.mxu2  ;;  %v906_v26 = vadd.f32 %v905_v34, %v891_v45  ;;  %v772_v3 = vpop.f32.mrf.mxu3 }
 0x1f8   :  { %v744_v9 = vpop.f32.mrf.mxu0  ;;  %v754_v25 = vpop.f32.mrf.mxu1  ;;  %v763_v12 = vadd.f32 %v762_v41, %v653_v61  ;;  %v773_v33 = vadd.f32 %v772_v3, %v1590_v7 }
 0x1f9   :  { %v745_v42 = vadd.f32 %v744_v9, %v618_v11  ;;  %v755_v6 = vadd.f32 %v754_v25, %v638_v22  ;;  %v882_v9 = vpop.permute.xlu0 %881  ;;  %v887_v45 = vpop.permute.xlu1 %886 }
 0x1fa   :  { %v787_v16 = vmax.f32 %v763_v12, 0.0  ;;  %v791_v28 = vmax.f32 %v773_v33, 0.0 }
 0x1fb   :  { %v780_v62 = vmax.f32 %v745_v42, 0.0  ;;  %v784_v11 = vmax.f32 %v755_v6, 0.0 }
 0x1fc   :  { %v899_v2 = vmul.f32 %v862_v48, %v787_v16  ;;  %v903_v24 = vmul.f32 %v882_v9, %v791_v28 }
 0x1fd   :  { %v892_v30 = vmul.f32 %v827_v18, %v780_v62  ;;  %v896_v14 = vmul.f32 %v847_v10, %v784_v11 }
 0x1ff   :  { %v907_v35 = vadd.f32 %v906_v26, %v892_v30  ;;  %v764_v1 = vpop.f32.mrf.mxu2  ;;  %v774_v61 = vpop.f32.mrf.mxu3 }
 0x200   :  { %v765_v22 = vadd.f32 %v764_v1, %v1584_v63  ;;  %v790_v63 = vmax.f32 %v770_v39, 0.0  ;;  %v775_v32 = vadd.f32 %v774_v61, %v1592_v60  ;;  %v927_v60 = vstv %s1611_s6 }
 0x201   :  { %v908_v51 = vadd.f32 %v907_v35, %v893_v4 }
 0x202   :  { %v788_v52 = vmax.f32 %v765_v22, 0.0  ;;  %v902_v41 = vmul.f32 %v877_v38, %v790_v63  ;;  %v792_v13 = vmax.f32 %v775_v32, 0.0 }
 0x203   :  { %v909_v54 = vadd.f32 %v908_v51, %v894_v40 }
 0x204   :  { %v900_v19 = vmul.f32 %v867_v21, %v788_v52  ;;  %v904_v42 = vmul.f32 %v887_v45, %v792_v13 }
 0x205   :  { %v910_v0 = vadd.f32 %v909_v54, %v895_v59 }
 0x207   :  { %v911_v18 = vadd.f32 %v910_v0, %v896_v14 }
 0x209   :  { %v912_v27 = vadd.f32 %v911_v18, %v897_v53 }
 0x20b   :  { %v913_v31 = vadd.f32 %v912_v27, %v898_v50 }
 0x20d   :  { %v914_v44 = vadd.f32 %v913_v31, %v899_v2 }
 0x20f   :  { %v915_v36 = vadd.f32 %v914_v44, %v900_v19 }
 0x211   :  { %v916_v8 = vadd.f32 %v915_v36, %v901_v20 }
 0x213   :  { %v917_v55 = vadd.f32 %v916_v8, %v902_v41 }
 0x215   :  { %v918_v25 = vadd.f32 %v917_v55, %v903_v24 }
 0x217   :  { %v919_v7 = vadd.f32 %v918_v25, %v904_v42 }
 0x219   :  { %v920_v5 = vrot.slane %v919_v7, 4 }
 0x21b   :  { %v921_v34 = vadd.f32 %v920_v5, %v919_v7 }
 0x21d   :  { %v922_v43 = vrot.slane %v921_v34, 2 }
 0x21f   :  { %v923_v62 = vadd.f32 %v922_v43, %v921_v34 }
 0x221   :  { %v924_v10 = vrot.slane %v923_v62, 1 }
 0x223   :  { %v925_v58 = vadd.f32 %v924_v10, %v923_v62 }
 0x225   :  { %v928_v26 = vadd.f32 %v927_v60, %v925_v58 }
 0x227   :  { %929 = vst [vmem:[%s1612_s7] sm:$0x1] %v928_v26 }

</bundles_post_ra>
